<compile_context>
chip_gen: v6e
topology: v6e:2x2x1
jax: 0.10.0
libtpu: 0.0.40
codegen_flags: <defaults>
</compile_context>

<pallas_src>
import math
from functools import partial

import jax
import jax.numpy as jnp
from jax.experimental import pallas as pl
from jax.experimental.pallas import tpu as pltpu

_EPS = 1e-12  # F.normalize default eps


def _round_up(x, m):
    return (x + m - 1) // m * m


def arcloss_kernel(x_ref, w_ref, o_ref, xn_ref, bottom_ref, *,
                   s, c_total, block_c, mask_cols):
    """Grid = (batch_tiles, 2, class_tiles); phase 0 = denominator, 1 = output."""
    p = pl.program_id(1)
    j = pl.program_id(2)

    @pl.when(jnp.logical_and(p == 0, j == 0))
    def _init():
        # Row L2-normalise this batch tile ONCE (not per (phase, class-tile)
        # step); rsqrt goes to the EUP slot instead of a VPU divide.
        x = x_ref[...].astype(jnp.float32)
        ssq = jnp.sum(x * x, axis=1, keepdims=True)
        inv_norm = jax.lax.rsqrt(jnp.maximum(ssq, jnp.float32(_EPS * _EPS)))
        xn_ref[...] = (x * inv_norm).astype(xn_ref.dtype)
        bottom_ref[...] = jnp.zeros_like(bottom_ref)

    # dot = X_n @ W_n on the MXU.  Note exp(cosa * s) == exp(dot) (cosa = dot/s),
    # so e_dot doubles as `top_` and as the denominator contribution.
    dot = jnp.dot(xn_ref[...], w_ref[...], preferred_element_type=jnp.float32)
    e_dot = jnp.exp(dot)

    @pl.when(p == 0)
    def _accumulate():
        if mask_cols:
            col = jax.lax.broadcasted_iota(jnp.int32, dot.shape, 1) + j * block_c
            contrib = jnp.where(col < c_total, e_dot, 0.0)
        else:
            contrib = e_dot
        bottom_ref[...] += jnp.sum(contrib, axis=1, keepdims=True)

    @pl.when(p == 1)
    def _emit():
        # a = acos(cosa), a in [0, pi]  =>  sin(a) = sqrt(1 - cosa^2)
        cosa = dot * jnp.float32(1.0 / s)
        sina = jnp.sqrt(jnp.maximum(1.0 - cosa * cosa, 0.0))
        # cos(a + 0.1) * s == dot * cos(0.1) - (s * sin(0.1)) * sin(a)
        top = jnp.exp(dot * jnp.float32(math.cos(0.1))
                      - sina * jnp.float32(s * math.sin(0.1)))
        denom = bottom_ref[...] - e_dot + top
        out = top * pl.reciprocal(denom, approx=True) + jnp.float32(1e-10)
        o_ref[...] = out.astype(o_ref.dtype)


def arcloss_forward(feature, W, s=10.0, *, block_b=256, block_c=512,
                    matmul_dtype=jnp.float32):
    B, D = feature.shape
    Dw, C = W.shape
    assert D == Dw

    # ---- hoisted out of the per-tile kernel body (done once) ---------------
    Wf = W.astype(jnp.float32)
    inv_col = jax.lax.rsqrt(
        jnp.maximum(jnp.sum(Wf * Wf, axis=0, keepdims=True),
                    jnp.float32(_EPS * _EPS)))
    w_n = (Wf * inv_col).astype(matmul_dtype)       # column-normalised weights

    # Lane-dense output tiling: classes padded to a multiple of 128, batch to 8.
    tb = min(_round_up(block_b, 8), _round_up(B, 8))
    tc = min(_round_up(block_c, 128), _round_up(C, 128))
    b_pad = _round_up(B, tb)
    c_pad = _round_up(C, tc)
    mask_cols = c_pad != C

    x_in = feature.astype(jnp.float32)
    if b_pad != B:
        x_in = jnp.pad(x_in, ((0, b_pad - B), (0, 0)))
    if c_pad != C:
        w_n = jnp.pad(w_n, ((0, 0), (0, c_pad - C)))

    n_b = b_pad // tb
    n_c = c_pad // tc
    mm_bytes = jnp.dtype(matmul_dtype).itemsize

    # VMEM budget: double-buffered in/out tiles + persistent scratch (+ headroom).
    need = (2 * (tb * D * 4 + D * tc * mm_bytes + tb * tc * 4)
            + tb * D * mm_bytes + tb * 128 * 4)
    vmem_limit = int(min(max(2 * need + (1 << 20), 16 << 20), 48 << 20))

    cost = pl.CostEstimate(
        flops=2 * (2 * b_pad * D * c_pad),          # matmul runs in both phases
        transcendentals=3 * b_pad * c_pad,          # exp(dot) x2 + top
        bytes_accessed=(b_pad * D * 4 + 2 * D * c_pad * mm_bytes
                        + b_pad * c_pad * 4),
    )

    out = pl.pallas_call(
        partial(arcloss_kernel, s=float(s), c_total=C, block_c=tc,
                mask_cols=mask_cols),
        out_shape=jax.ShapeDtypeStruct((b_pad, c_pad), jnp.float32),
        grid_spec=pltpu.PrefetchScalarGridSpec(
            num_scalar_prefetch=0,
            grid=(n_b, 2, n_c),
            in_specs=[
                pl.BlockSpec((tb, D), lambda i, p, j: (i, 0)),
                pl.BlockSpec((D, tc), lambda i, p, j: (0, j)),
            ],
            # Phase 0 parks on block (i, 0) (never written); phase 1 writes
            # each (i, j) exactly once -> every HBM block stored once, fully.
            out_specs=pl.BlockSpec((tb, tc), lambda i, p, j: (i, p * j)),
            scratch_shapes=[
                pltpu.VMEM((tb, D), matmul_dtype),   # normalised batch tile
                pltpu.VMEM((tb, 1), jnp.float32),    # softmax denominator
            ],
        ),
        compiler_params=pltpu.CompilerParams(
            dimension_semantics=("parallel", "arbitrary", "arbitrary"),
            vmem_limit_bytes=vmem_limit),
        cost_estimate=cost,
    )(x_in, w_n)

    return out[:B, :C]


def arcloss_reference(feature, W, s=10.0):
    # Pure-JAX reference mirroring the PyTorch forward exactly.
    eps = 1e-12
    w_n = W / jnp.maximum(jnp.linalg.norm(W, axis=0, keepdims=True), eps)
    x_n = feature / jnp.maximum(
        jnp.linalg.norm(feature, axis=1, keepdims=True), eps)
    cosa = jnp.matmul(x_n, w_n) / s
    a = jnp.arccos(jnp.clip(cosa, -1.0, 1.0))
    top = jnp.exp(jnp.cos(a + 0.1) * s)
    top_ = jnp.exp(jnp.cos(a) * s)
    bottom = jnp.sum(jnp.exp(cosa * s), axis=1, keepdims=True)
    return top / (bottom - top_ + top) + 1e-10


if __name__ == "__main__":
    s = 10.0
    key = jax.random.PRNGKey(0)
    k_w1, k_x1, k_w2, k_x2 = jax.random.split(key, 4)

    # Test 1: toy module shapes (single batch tile, classes padded 16 -> 128).
    B1, D1, C1 = 8, 32, 16
    W1 = jax.random.normal(k_w1, (D1, C1), dtype=jnp.float32)
    X1 = jax.random.normal(k_x1, (B1, D1), dtype=jnp.float32)
    out1 = jax.block_until_ready(arcloss_forward(X1, W1, s=s))
    ref1 = arcloss_reference(X1, W1, s=s)
    assert out1.shape == (B1, C1)
    assert jnp.allclose(out1, ref1, atol=5e-3, rtol=5e-3), (
        f"test1 max err {jnp.max(jnp.abs(out1 - ref1))}")

    # Test 2: multi-tile grid (3 batch tiles x 2 class tiles, masked tail cols)
    # exercising the flash-style denominator accumulation across class tiles.
    B2, D2, C2 = 24, 32, 200
    W2 = jax.random.normal(k_w2, (D2, C2), dtype=jnp.float32)
    X2 = jax.random.normal(k_x2, (B2, D2), dtype=jnp.float32)
    out2 = jax.block_until_ready(
        arcloss_forward(X2, W2, s=s, block_b=8, block_c=128))
    ref2 = arcloss_reference(X2, W2, s=s)
    assert out2.shape == (B2, C2)
    assert jnp.allclose(out2, ref2, atol=5e-3, rtol=5e-3), (
        f"test2 max err {jnp.max(jnp.abs(out2 - ref2))}")

    # Test 3: bf16 MXU operands (v6e/v7x fast path), looser tolerance.
    out3 = jax.block_until_ready(
        arcloss_forward(X2, W2, s=s, block_b=8, block_c=128,
                        matmul_dtype=jnp.bfloat16))
    assert out3.shape == (B2, C2)
    assert jnp.allclose(out3, ref2, atol=1e-2, rtol=5e-2), (
        f"test3 max err {jnp.max(jnp.abs(out3 - ref2))}")

    print("KERNEL_OK")
</pallas_src>

<mosaic_0001>
module attributes {stable_mosaic.version = 11 : i64} {
  func.func @arcloss_kernel(%arg0: i32, %arg1: i32, %arg2: i32, %arg3: memref<8x32xf32, #tpu.memory_space<vmem>>, %arg4: memref<32x128xf32, #tpu.memory_space<vmem>>, %arg5: memref<8x128xf32, #tpu.memory_space<vmem>>, %arg6: memref<8x32xf32, #tpu.memory_space<vmem>>, %arg7: memref<8x1xf32, #tpu.memory_space<vmem>>) attributes {dimension_semantics = [#tpu.dimension_semantics<parallel>, #tpu.dimension_semantics<arbitrary>, #tpu.dimension_semantics<arbitrary>], iteration_bounds = array<i64: 1, 2, 1>, scalar_prefetch = 0 : i64, scratch_operands = 2 : i64, tpu.core_type = #tpu.core_type<tc>, window_params = [{transform_indices = @transform_0, window_bounds = array<i64: 8, 32>}, {transform_indices = @transform_1, window_bounds = array<i64: 32, 128>}, {transform_indices = @transform_2, window_bounds = array<i64: 8, 128>}]} {
    %c0_i32 = arith.constant 0 : i32
    %0 = arith.cmpi eq, %arg1, %c0_i32 : i32
    %c0_i32_0 = arith.constant 0 : i32
    %1 = arith.cmpi eq, %arg2, %c0_i32_0 : i32
    %2 = arith.andi %0, %1 : i1
    %3 = arith.extui %2 : i1 to i32
    %c0_i32_1 = arith.constant 0 : i32
    %4 = arith.cmpi ne, %3, %c0_i32_1 : i32
    scf.if %4 {
      %c0_8 = arith.constant 0 : index
      %c0_9 = arith.constant 0 : index
      %15 = vector.load %arg3[%c0_8, %c0_9] : memref<8x32xf32, #tpu.memory_space<vmem>>, vector<8x32xf32>
      %16 = arith.mulf %15, %15 : vector<8x32xf32>
      %cst_10 = arith.constant dense<0.000000e+00> : vector<8xf32>
      %17 = vector.multi_reduction <add>, %16, %cst_10 [1] : vector<8x32xf32> to vector<8xf32>
      %18 = vector.shape_cast %17 : vector<8xf32> to vector<8x1xf32>
      %cst_11 = arith.constant 1.000000e-24 : f32
      %19 = vector.broadcast %cst_11 : f32 to vector<8x1xf32>
      %20 = arith.maximumf %18, %19 : vector<8x1xf32>
      %21 = math.rsqrt %20 : vector<8x1xf32>
      %22 = vector.broadcast %21 : vector<8x1xf32> to vector<8x32xf32>
      %23 = arith.mulf %15, %22 : vector<8x32xf32>
      %c0_12 = arith.constant 0 : index
      %c0_13 = arith.constant 0 : index
      %24 = vector.load %arg6[%c0_12, %c0_13] : memref<8x32xf32, #tpu.memory_space<vmem>>, vector<8x32xf32>
      tpu.vector_store %arg6[%c0_12, %c0_13], %23 {strides = array<i32>} : memref<8x32xf32, #tpu.memory_space<vmem>>, vector<8x32xf32>,
      %cst_14 = arith.constant 0.000000e+00 : f32
      %25 = vector.broadcast %cst_14 : f32 to vector<8x1xf32>
      %c0_15 = arith.constant 0 : index
      %c0_16 = arith.constant 0 : index
      %26 = vector.load %arg7[%c0_15, %c0_16] : memref<8x1xf32, #tpu.memory_space<vmem>>, vector<8x1xf32>
      tpu.vector_store %arg7[%c0_15, %c0_16], %25 {strides = array<i32>} : memref<8x1xf32, #tpu.memory_space<vmem>>, vector<8x1xf32>,
    } else {
    }
    %c0 = arith.constant 0 : index
    %c0_2 = arith.constant 0 : index
    %5 = vector.load %arg6[%c0, %c0_2] : memref<8x32xf32, #tpu.memory_space<vmem>>, vector<8x32xf32>
    %c0_3 = arith.constant 0 : index
    %c0_4 = arith.constant 0 : index
    %6 = vector.load %arg4[%c0_3, %c0_4] : memref<32x128xf32, #tpu.memory_space<vmem>>, vector<32x128xf32>
    %cst = arith.constant dense<0.000000e+00> : vector<8x128xf32>
    %7 = tpu.matmul %5, %6, %cst {dimension_numbers = #tpu.dot_dimension_numbers<[1], [0], [0], [1], [0, 0, 1, 1], [], []>} : vector<8x32xf32>, vector<32x128xf32>, vector<8x128xf32> -> vector<8x128xf32>
    %8 = math.exp %7 : vector<8x128xf32>
    %c0_i32_5 = arith.constant 0 : i32
    %9 = arith.cmpi eq, %arg1, %c0_i32_5 : i32
    %10 = arith.extui %9 : i1 to i32
    %c0_i32_6 = arith.constant 0 : i32
    %11 = arith.cmpi ne, %10, %c0_i32_6 : i32
    scf.if %11 {
      %15 = tpu.iota {dimensions = array<i32: 1>} : vector<8x128xi32>
      %c128_i32 = arith.constant 128 : i32
      %16 = arith.muli %arg2, %c128_i32 : i32
      %17 = vector.broadcast %16 : i32 to vector<8x128xi32>
      %18 = arith.addi %15, %17 : vector<8x128xi32>
      %c16_i32 = arith.constant 16 : i32
      %19 = vector.broadcast %c16_i32 : i32 to vector<8x128xi32>
      %20 = arith.cmpi slt, %18, %19 : vector<8x128xi32>
      %cst_8 = arith.constant 0.000000e+00 : f32
      %21 = vector.broadcast %cst_8 : f32 to vector<8x128xf32>
      %22 = arith.select %20, %8, %21 : vector<8x128xi1>, vector<8x128xf32>
      %c0_9 = arith.constant 0 : index
      %c0_10 = arith.constant 0 : index
      %23 = vector.load %arg7[%c0_9, %c0_10] : memref<8x1xf32, #tpu.memory_space<vmem>>, vector<8x1xf32>
      %cst_11 = arith.constant dense<0.000000e+00> : vector<8xf32>
      %24 = vector.multi_reduction <add>, %22, %cst_11 [1] : vector<8x128xf32> to vector<8xf32>
      %25 = vector.shape_cast %24 : vector<8xf32> to vector<8x1xf32>
      %26 = arith.addf %23, %25 : vector<8x1xf32>
      %c0_12 = arith.constant 0 : index
      %c0_13 = arith.constant 0 : index
      %27 = vector.load %arg7[%c0_12, %c0_13] : memref<8x1xf32, #tpu.memory_space<vmem>>, vector<8x1xf32>
      tpu.vector_store %arg7[%c0_12, %c0_13], %26 {strides = array<i32>} : memref<8x1xf32, #tpu.memory_space<vmem>>, vector<8x1xf32>,
    } else {
    }
    %c1_i32 = arith.constant 1 : i32
    %12 = arith.cmpi eq, %arg1, %c1_i32 : i32
    %13 = arith.extui %12 : i1 to i32
    %c0_i32_7 = arith.constant 0 : i32
    %14 = arith.cmpi ne, %13, %c0_i32_7 : i32
    scf.if %14 {
      %cst_8 = arith.constant 1.000000e-01 : f32
      %15 = vector.broadcast %cst_8 : f32 to vector<8x128xf32>
      %16 = arith.mulf %7, %15 : vector<8x128xf32>
      %17 = arith.mulf %16, %16 : vector<8x128xf32>
      %cst_9 = arith.constant 1.000000e+00 : f32
      %18 = vector.broadcast %cst_9 : f32 to vector<8x128xf32>
      %19 = arith.subf %18, %17 : vector<8x128xf32>
      %cst_10 = arith.constant 0.000000e+00 : f32
      %20 = vector.broadcast %cst_10 : f32 to vector<8x128xf32>
      %21 = arith.maximumf %19, %20 : vector<8x128xf32>
      %22 = math.sqrt %21 : vector<8x128xf32>
      %cst_11 = arith.constant 0.995004177 : f32
      %23 = vector.broadcast %cst_11 : f32 to vector<8x128xf32>
      %24 = arith.mulf %7, %23 : vector<8x128xf32>
      %cst_12 = arith.constant 0.998334169 : f32
      %25 = vector.broadcast %cst_12 : f32 to vector<8x128xf32>
      %26 = arith.mulf %22, %25 : vector<8x128xf32>
      %27 = arith.subf %24, %26 : vector<8x128xf32>
      %28 = math.exp %27 : vector<8x128xf32>
      %c0_13 = arith.constant 0 : index
      %c0_14 = arith.constant 0 : index
      %29 = vector.load %arg7[%c0_13, %c0_14] : memref<8x1xf32, #tpu.memory_space<vmem>>, vector<8x1xf32>
      %30 = vector.broadcast %29 : vector<8x1xf32> to vector<8x128xf32>
      %31 = arith.subf %30, %8 : vector<8x128xf32>
      %32 = arith.addf %31, %28 : vector<8x128xf32>
      %33 = tpu.reciprocal %32 {approx = true} : vector<8x128xf32> -> vector<8x128xf32>
      %34 = arith.mulf %28, %33 : vector<8x128xf32>
      %cst_15 = arith.constant 1.000000e-10 : f32
      %35 = vector.broadcast %cst_15 : f32 to vector<8x128xf32>
      %36 = arith.addf %34, %35 : vector<8x128xf32>
      %c0_16 = arith.constant 0 : index
      %c0_17 = arith.constant 0 : index
      %37 = vector.load %arg5[%c0_16, %c0_17] : memref<8x128xf32, #tpu.memory_space<vmem>>, vector<8x128xf32>
      tpu.vector_store %arg5[%c0_16, %c0_17], %36 {strides = array<i32>} : memref<8x128xf32, #tpu.memory_space<vmem>>, vector<8x128xf32>,
    } else {
    }
    return
  }
  func.func @transform_0(%arg0: i32, %arg1: i32, %arg2: i32) -> (i32, i32) {
    %c0_i32 = arith.constant 0 : i32
    %c0_i32_0 = arith.constant 0 : i32
    return %arg0, %c0_i32 : i32, i32
  }
  func.func @transform_1(%arg0: i32, %arg1: i32, %arg2: i32) -> (i32, i32) {
    %c0_i32 = arith.constant 0 : i32
    %c0_i32_0 = arith.constant 0 : i32
    return %c0_i32, %arg2 : i32, i32
  }
  func.func @transform_2(%arg0: i32, %arg1: i32, %arg2: i32) -> (i32, i32) {
    %0 = arith.muli %arg1, %arg2 : i32
    %c0_i32 = arith.constant 0 : i32
    return %arg0, %0 : i32, i32
  }
}

</mosaic_0001>

<bundles_post_ra>
// kernel: tpu_custom_call.1
= control target key start
LH: loop header
LB: loop body
LE: loop exit
PB: predicated region body
PF: predicated region fallthrough
CT: control target
= control target key end

     0   :  { %7 = vsyncpa [#allocation5], 0  ;;  %s775_s0 = inlined_call_operand.hbm [shape: f32[8,32], index: 0, kind: input, shape index: {}]   ;;  %s776_s1 = inlined_call_operand.hbm [shape: f32[32,128], index: 1, kind: input, shape index: {}]   ;;  %s777_s2 = inlined_call_operand.hbm [shape: f32[8,128], index: 2, kind: output, shape index: {}]  }
   0x1   :  { %8 = vsyncpa [#allocation8], 0 }
   0x2   :  { %9 = vsyncpa [#allocation6], 0 }
   0x3   :  { %11 = vsyncpa [#allocation6 + $0x1], 0  ;;  %s679_s9 = smov 0   ;;  %s681_s10 = smov 0  }
   0x4   :  { %s683_s11 = smov 0  }
   0x5 LB: > { %s436_s12 = sadd.s32 4294967295, %s653_s11   ;;  %s437_s13 = sadd.s32 4294967294, %s653_s11   ;;  %s653_s11 = sphi %s683_s11, %s17_s11   ;;  %s649_s10 = sphi %s681_s10, %s788_s10   ;;  %s645_s9 = sphi %s679_s9, %s787_s9  }
   0x6   : > { %s32_s14 = sadd.s32 1, %s649_s10  ;;  %p438_p0 = scmp.ge.s32.totalorder %s653_s11, 1 }
   0x7   : > { %p34_p1 = scmp.ge.s32.totalorder %s32_s14, 2  ;;  %p123_p2 = scmp.lt.s32.totalorder %s653_s11, 3 }
   0x8   : > { %p701_p3 = scmp.eq.s32.totalorder %s436_s12, 0  ;;  %s655_s17 = smov [#allocation4]  }
   0x9   : > { %s790_s14 = smov (%p34_p1, %s32_s14), 0  ;;  %p707_p4 = pnand %p438_p0, %p123_p2 }
   0xa   : > { %s781_s15 = scalar_select %p701_p3, 1, 0 }
   0xb   : > { %s782_s16 = scalar_select %p707_p4, 1, 0 }
   0xc   : > { %s138_s18 = sshll.u32 %s655_s17, 4  ;;  %p481_p5 = pneg %p707_p4  ;;  %s139_s18 = int_to_ptr.vmem [resolvable:$true] %s138_s18 }
   0xd   : > { %s656_s19 = smov [#allocation7]   ;;  %s554_s22 = scalar_lea.vmem %s139_s18, 128 }
   0xe   : > { %s150_s20 = sshll.u32 %s656_s19, 4  ;;  %p715_p6 = pnand %p701_p3, %p481_p5  ;;  %s151_s20 = int_to_ptr.vmem [resolvable:$true] %s150_s20 }
   0xf   : > { %p555_p8 = scmp.ne.s32.totalorder %s139_s18, %s554_s22  ;;  %p562_p11 = scmp.lt.s32.totalorder %s139_s18, %s139_s18 }
  0x10   : > { %p545_p7 = pneg %p715_p6  ;;  %p563_p12 = scmp.lt.s32.totalorder %s554_s22, %s554_s22 }
  0x12   : > { %p557_p9 = pnand %p555_p8, %p545_p7  ;;  %p564_p13 = por %p563_p12, %p562_p11 }
  0x14   : > { %p558_p10 = pneg %p557_p9 }
  0x16   : > { %p565_p0 = pnand %p564_p13, %p558_p10 }
  0x18   : > { %568 = shalt.err (!%p565_p0)
}
  0x19   : > { %484 = dma.hbm_to_vmem [thread:$0]  (!%p715_p6), %s775_s0, 128, %s139_s18, [#allocation5]  }
  0x1a   : > { %s580_s25 = scalar_lea.vmem %s151_s20, 512  ;;  %p588_p8 = scmp.lt.s32.totalorder %s151_s20, %s151_s20 }
  0x1b   : > { %p581_p1 = scmp.ne.s32.totalorder %s151_s20, %s580_s25  ;;  %p589_p9 = scmp.lt.s32.totalorder %s580_s25, %s580_s25 }
  0x1d   : > { %p583_p2 = pnand %p581_p1, %p545_p7  ;;  %p590_p3 = por %p589_p9, %p588_p8 }
  0x1f   : > { %p584_p5 = pneg %p583_p2 }
  0x21   : > { %p591_p4 = pnand %p590_p3, %p584_p5 }
  0x23   : > { %594 = shalt.err (!%p591_p4)
}
  0x24   : > { %s657_s26 = smov 128   ;;  %s658_s27 = smov 8  }
  0x25   : > { %487 = dma.hbm_to_vmem [thread:$0]  (!%p715_p6), %s776_s1, 512, %s151_s20, [#allocation8], %s657_s26, %s657_s26, %s658_s27  }
  0x26   : > { %p784_p10 = scmp.ne.s32.totalorder %s782_s16, 0 }
  0x27   : > { %p785_p11 = scmp.ne.s32.totalorder (!%p784_p10), %s781_s15, 0 }
  0x28   : > { %166 = sbr.rel (%p784_p10) target bundleno = 744 (0x2e8), region = 28 }
  0x2d   : > { %632 = dma.done.wait (%p785_p11), [#allocation5], 128  }
  0x2e   : > { %634 = vsyncadd (%p785_p11), [#allocation5], 4294967168 }
  0x2f   : > { %636 = dma.done.wait (%p785_p11), [#allocation8], 512  }
  0x30   : > { %638 = vsyncadd (%p785_p11), [#allocation8], 4294966784  ;;  %p188_p3 = scmp.eq.s32.totalorder %s645_s9, 0 }
  0x31   : > { %v194_v0 = vld [vmem:[#allocation4] sm:$0xff] (%p188_p3)  ;;  %vm196_vm0 = vcmask (%p188_p3), 261120   ;;  %vm204_vm1 = vcmask (%p188_p3), 7168   ;;  %v659_v3 = vmov (%p188_p3), 0.0  }
  0x32   : > { %193 = sbr.rel (!%p188_p3) target bundleno = 210 (0xd2), region = 40  ;;  %v195_v1 = vmul.f32 (%p188_p3), %v194_v0, %v194_v0  ;;  %205 = vst.msk [vmem:[#allocation3] sm:$0xff] (%p188_p3), %vm204_vm1, %v659_v3 }
  0x34   : > { %v197_v2 = vsel (%p188_p3), %vm196_vm0, %v195_v1, 0.0 }
  0x35   : > { %198 = vadd.xlane.f32.xlu0 (%p188_p3), %v197_v2 }
  0xbe   : > { %v199_v4 = vpop.xlane.xlu0 %198 }
  0xbf   : > { %v200_v5 = vmax.f32 %v199_v4, 1e-24 }
  0xc1   : > { %532 = vrsqrt.f32 %v200_v5 }
  0xce   : > { %v533_v6 = vpop.eup %532 }
  0xcf   : > { %v202_v7 = vmul.f32 %v533_v6, %v194_v0 }
  0xd1   : > { %203 = vst.msk [vmem:[#allocation2] sm:$0xff] %vm196_vm0, %v202_v7 }
  0xd2 PF: > { %v210_v8 = vld [vmem:[#allocation7 + $0x18] sm:$0xff]  ;;  %v660_v9 = vmov 0.0   ;;  %v209_v10 = vld [vmem:[#allocation7 + $0x10] sm:$0xff]  ;;  %vm661_vm2 = vmmov 0   ;;  %v208_v11 = vld [vmem:[#allocation7 + $0x8] sm:$0xff]  ;;  %vm211_vm3 = vcmask 261120  }
  0xd3   : > { %458 = vmatprep.subr.mxu0 %v660_v9  ;;  %466 = vmatprep.mubr.msk.f32.mxu0 %vm661_vm2, %v660_v9  ;;  %v207_v12 = vld [vmem:[#allocation7] sm:$0xff]  ;;  %p446_p4 = scmp.ne.s32.totalorder %s645_s9, 0 }
  0xd4   : > { %459 = vmatpush3.msra.mxu0 %v210_v8 }
  0xd5   : > { %460 = vmatprep.subr.mxu0 %v660_v9 }
  0xd6   : > { %461 = vmatpush3.msra.mxu0 %v209_v10 }
  0xd7   : > { %462 = vmatprep.subr.mxu0 %v660_v9 }
  0xd8   : > { %463 = vmatpush3.msra.mxu0 %v208_v11  ;;  %v206_v13 = vld [vmem:[#allocation2] sm:$0xff] }
  0xd9   : > { %464 = vmatprep.subr.mxu0 %v660_v9 }
  0xda   : > { %465 = vmatpush3.msra.mxu0 %v207_v12 }
  0xdb   : > { %467 = vmatmul.mubr.msk.f32.vlgmr.msra.gmra.mxu0 %vm211_vm3, %v206_v13 }
 0x19b   : > { %v281_v14 = vpop.f32.mrf.mxu0 }
 0x19c   : > { %v285_v15 = vmul.f32 1.442695, %v281_v14 }
 0x19d   : > { %v468_v16 = vpop.f32.mrf.mxu0 }
 0x19e   : > { %534 = vpow2.f32 %v285_v15 }
 0x1a7   : > { %289 = sbr.rel (%p446_p4) target bundleno = 575 (0x23f), region = 44 }
 0x1ab   : > { %v535_v17 = vpop.eup %534 }
 0x1ac   : > { %v290_v18 = vlaneseq  ;;  %v297_v21 = vld [vmem:[#allocation3] sm:$0xff]  ;;  %vm301_vm5 = vcmask 7168  }
 0x1ae   : > { %v291_v19 = vand.u32 127, %v290_v18 }
 0x1b0   : > { %vm295_vm4 = vcmp.lt.s32.totalorder %v291_v19, 16 }
 0x1b1   : > { %v296_v20 = vsel %vm295_vm4, %v535_v17, 0.0 }
 0x1b2   : > { %298 = vadd.xlane.f32.xlu0 %v296_v20 }
 0x23b   : > { %v299_v22 = vpop.xlane.xlu0 %298 }
 0x23c   : > { %v300_v23 = vadd.f32 %v299_v22, %v297_v21 }
 0x23e   : > { %302 = vst.msk [vmem:[#allocation3] sm:$0xff] %vm301_vm5, %v300_v23 }
 0x23f PF: > { %p447_p6 = scmp.ne.s32.totalorder %s645_s9, 1 }
 0x241   : > { %306 = sbr.rel (%p447_p6) target bundleno = 731 (0x2db), region = 48 }
 0x246   : > { %v323_v24 = vld [vmem:[#allocation3] sm:$0xff]  ;;  %v662_v25 = vmov 0   ;;  %v307_v26 = vmul.f32 0.1, %v281_v14  ;;  %v318_v35 = vmul.f32 0.9950042, %v281_v14 }
 0x247   : > { %536 = vset.pattern.permute.xlu0 %v662_v25 }
 0x248   : > { %326 = vperm.xlu0 %536, %v323_v24   ;;  %v308_v27 = vmul.f32 %v307_v26, %v307_v26 }
 0x24a   : > { %v309_v28 = vsub.f32 1.0, %v308_v27 }
 0x24c   : > { %v310_v29 = vmax.f32 %v309_v28, 0.0 }
 0x24e   : > { %537 = vrsqrt.f32 %v310_v29  ;;  %vm313_vm6 = vcmp.eq.f32.partialorder %v310_v29, inf  ;;  %v316_v32 = vand.u32 2147483648, %v310_v29  ;;  %vm315_vm7 = vcmp.eq.f32.partialorder %v310_v29, 0.0 }
 0x25b   : > { %v538_v30 = vpop.eup %537 }
 0x25c   : > { %v312_v31 = vmul.f32 %v538_v30, %v310_v29 }
 0x25e   : > { %v314_v33 = vsel %vm313_vm6, %v310_v29, %v312_v31 }
 0x25f   : > { %v317_v34 = vsel %vm315_vm7, %v316_v32, %v314_v33 }
 0x260   : > { %v319_v36 = vmul.f32 0.99833417, %v317_v34 }
 0x262   : > { %v320_v37 = vsub.f32 %v318_v35, %v319_v36 }
 0x264   : > { %v321_v38 = vmul.f32 1.442695, %v320_v37 }
 0x266   : > { %539 = vpow2.f32 %v321_v38 }
 0x273   : > { %v540_v39 = vpop.eup %539 }
 0x2c3   : > { %v327_v40 = vpop.permute.xlu0 %326 }
 0x2c4   : > { %v329_v41 = vsub.f32 %v327_v40, %v535_v17 }
 0x2c6   : > { %v330_v42 = vadd.f32 %v540_v39, %v329_v41 }
 0x2c8   : > { %541 = vrcp.f32 %v330_v42 }
 0x2d5   : > { %v542_v43 = vpop.eup %541 }
 0x2d6   : > { %v332_v44 = vmul.f32 %v542_v43, %v540_v39 }
 0x2d8   : > { %v333_v45 = vadd.f32 1e-10, %v332_v44 }
 0x2da   : > { %334 = vst [vmem:[#allocation9] sm:$0xff] %v333_v45 }
 0x2db PF: > { %p752_p7 = scmp.eq.s32.totalorder %s436_s12, 1  ;;  %s663_s3 = smov [#allocation9]  }
 0x2dc   : > { %s351_s4 = sshll.u32 %s663_s3, 4  ;;  %s352_s4 = int_to_ptr.vmem [resolvable:$true] %s351_s4 }
 0x2dd   : > { %s595_s5 = scalar_lea.vmem %s352_s4, 128  ;;  %s601_s6 = scalar_lea.vmem %s352_s4, 256 }
 0x2de   : > { %p596_p12 = scmp.ne.s32.totalorder %s352_s4, %s595_s5  ;;  %p602_p1 = scmp.lt.s32.totalorder %s352_s4, %s352_s4 }
 0x2df   : > { %p603_p2 = scmp.lt.s32.totalorder %s601_s6, %s595_s5 }
 0x2e0   : > { %p597_p13 = pnand %p596_p12, %p752_p7 }
 0x2e1   : > { %p604_p5 = por %p603_p2, %p602_p1 }
 0x2e2   : > { %p598_p0 = pneg %p597_p13 }
 0x2e4   : > { %p605_p8 = pnand %p604_p5, %p598_p0 }
 0x2e6   : > { %608 = shalt.err (!%p605_p8)
}
 0x2e7   : > { %478 = dma.vmem_to_hbm [thread:$0]  (%p752_p7), %s352_s4, 128, %s777_s2, [#allocation6]  }
 0x2e8 PF: > { %p497_p9 = scmp.ge.s32.totalorder %s653_s11, 2  ;;  %p498_p10 = scmp.eq.s32.totalorder %s437_s13, 1 }
 0x2ea   : > { %p489_p11 = pnand %p498_p10, %p497_p9 }
 0x2ec   : > { %p490_p3 = pneg %p489_p11 }
 0x2ee   : > { %640 = dma.done.wait (%p490_p3), [#allocation6], 128  }
 0x2ef   : > { %642 = vsyncadd (%p490_p3), [#allocation6], 4294967168  ;;  %s17_s11 = sadd.s32 1, %s653_s11   ;;  %s787_s9 = smov %s649_s10 }
 0x2f0   : > { %p14_p4 = scmp.ge.s32.totalorder %s17_s11, 4   ;;  %s788_s10 = smov %s790_s14 }
 0x2f2   :  { %16 = sbr.rel (!%p14_p4) target bundleno = 5 (0x5), region = 83 }
 0x2f7   :  { %369 = vsyncpa [#allocation5], 1 }
 0x2f8   :  { %371 = vsyncpa [#allocation5 + $0x1], 1 }
 0x2f9   :  { %372 = vsyncpa [#allocation8], 1 }
 0x2fa   :  { %373 = vsyncpa [#allocation6], 1 }
 0x2fb   :  { %375 = vsyncpa [#allocation6 + $0x1], 1 }

</bundles_post_ra>
